<compile_context>
chip_gen: v7x
topology: tpu7x:2x2x1
jax: 0.10.0
libtpu: 0.0.40
codegen_flags: <defaults>
</compile_context>

<pallas_src>
import functools

import jax
import jax.numpy as jnp
from jax import lax
from jax.experimental import pallas as pl
from jax.experimental.pallas import tpu as pltpu

LANE = 128


def _round_up(n, m):
    return ((n + m - 1) // m) * m


def _pad_to(a, shape):
    pads = [(0, t - s) for s, t in zip(a.shape, shape)]
    return jnp.pad(a, pads)


def _vmem_capacity_bytes():
    """Physical per-core VMEM; conservative fallback if the query fails."""
    try:
        cap = getattr(pltpu.get_tpu_info(), "vmem_capacity_bytes", None)
        if cap:
            return int(cap)
    except Exception:
        pass
    return 64 << 20  # v7x per-TC size: safe lower bound for all generations


def _vpu_supports_bf16():
    """bf16 VALU exists on v6e / v7x; default to f32 ReLU elsewhere."""
    try:
        kind = jax.devices()[0].device_kind.lower()
    except Exception:
        return False
    return any(tag in kind for tag in ("v6", "v7", "7x"))


# --------------------------------------------------------------------------
# Kernels
# --------------------------------------------------------------------------

def deep_relu_kernel_resident(x_ref, w_in_ref, b_in_ref, w_h_ref, b_h_ref,
                              w_out_t_ref, b_out_ref, o_ref, *, relu_bf16):
    """One batch tile; full hidden weight stack resident in VMEM.

    x_ref       : (TB, input_dim)     bf16  (un-padded feature dim)
    w_in_ref    : (input_dim, W)      bf16
    b_in_ref    : (1, W)              f32
    w_h_ref     : (depth, W, W)       bf16
    b_h_ref     : (depth, 1, W)       f32
    w_out_t_ref : (1, W)              bf16  (transposed output projection)
    b_out_ref   : (1, 1)              f32
    o_ref       : (1, 1, TB)          f32   lane-dense output row
    """
    # Input linear, no activation (matches the PyTorch forward).
    h = jnp.dot(x_ref[...], w_in_ref[...],
                preferred_element_type=jnp.float32) + b_in_ref[...]

    depth = w_h_ref.shape[0]

    if relu_bf16:
        # v6e/v7x: carry bf16 between layers (half the VPU epilogue passes).
        h = h.astype(jnp.bfloat16)

        def layer(i, h):
            hf = jnp.dot(h, w_h_ref[i],
                         preferred_element_type=jnp.float32) + b_h_ref[i]
            return jnp.maximum(hf.astype(jnp.bfloat16), 0.0)
    else:
        # v5e and older: no bf16 VPU path, keep ReLU in f32.
        def layer(i, h):
            hf = jnp.dot(h.astype(jnp.bfloat16), w_h_ref[i],
                         preferred_element_type=jnp.float32) + b_h_ref[i]
            return jnp.maximum(hf, 0.0)

    h = lax.fori_loop(0, depth, layer, h, unroll=depth <= 8)

    # Output projection as a (1, TB) row: dot(w_out^T, h^T).  The .T on the RHS
    # fuses into the MXU transposed-operand load (same pattern as flash attn).
    h_bf = h if relu_bf16 else h.astype(jnp.bfloat16)
    y = jnp.dot(w_out_t_ref[...], h_bf.T,
                preferred_element_type=jnp.float32) + b_out_ref[...]
    o_ref[...] = y.reshape(o_ref.shape)


def deep_relu_kernel_streamed(x_ref, w_in_ref, b_in_ref, w_h_ref, b_h_ref,
                              w_out_t_ref, b_out_ref, o_ref, h_ref):
    """Layer-streamed variant: grid = (batch_tiles, depth).

    One hidden layer's weights (1, W, W) are DMA'd per grid step (auto
    double-buffered); the activation h lives in a VMEM scratch across the
    depth axis.  Used when the resident weight stack would bust VMEM.
    """
    d = pl.program_id(1)

    @pl.when(d == 0)
    def _():
        h_ref[...] = jnp.dot(x_ref[...], w_in_ref[...],
                             preferred_element_type=jnp.float32) + b_in_ref[...]

    hf = jnp.dot(h_ref[...].astype(jnp.bfloat16), w_h_ref[0],
                 preferred_element_type=jnp.float32) + b_h_ref[0]
    h_ref[...] = jnp.maximum(hf, 0.0)

    @pl.when(d == pl.num_programs(1) - 1)
    def _():
        h_bf = h_ref[...].astype(jnp.bfloat16)
        y = jnp.dot(w_out_t_ref[...], h_bf.T,
                    preferred_element_type=jnp.float32) + b_out_ref[...]
        o_ref[...] = y.reshape(o_ref.shape)


# --------------------------------------------------------------------------
# Wrapper
# --------------------------------------------------------------------------

def prepare_params(w_in, b_in, w_h, b_h, w_out, b_out):
    """Pad/cast parameters once (outside the per-call hot path)."""
    depth, width, _ = w_h.shape
    wpad = _round_up(width, LANE)
    return (
        _pad_to(jnp.asarray(w_in), (w_in.shape[0], wpad)).astype(jnp.bfloat16),
        _pad_to(jnp.asarray(b_in), (1, wpad)).astype(jnp.float32),
        _pad_to(jnp.asarray(w_h), (depth, wpad, wpad)).astype(jnp.bfloat16),
        _pad_to(jnp.asarray(b_h), (depth, 1, wpad)).astype(jnp.float32),
        _pad_to(jnp.asarray(w_out).T, (1, wpad)).astype(jnp.bfloat16),
        jnp.asarray(b_out).reshape(1, 1).astype(jnp.float32),
    )


def deep_relu_net(x, params, *, block_batch=256, stream_layers=None,
                  interpret=False):
    """Pallas forward pass on prepared (padded, bf16) params."""
    w_in_p, b_in_p, w_h_p, b_h_p, w_out_t_p, b_out_p = params
    batch, input_dim = x.shape
    depth, wpad, _ = w_h_p.shape
    assert w_in_p.shape == (input_dim, wpad)

    # Batch tile: multiple of 16 (bf16 sublane packing); sweep 256-1024 for perf.
    tb = max(16, min(_round_up(block_batch, 16), _round_up(batch, 16)))
    pb = _round_up(batch, tb)
    n_tiles = pb // tb

    xp = x if pb == batch else jnp.pad(x, ((0, pb - batch), (0, 0)))
    xp = xp.astype(jnp.bfloat16)

    relu_bf16 = _vpu_supports_bf16()

    # ---- VMEM budgeting (generation-aware) -------------------------------
    vmem_cap = _vmem_capacity_bytes()
    resident_w_bytes = 2 * (w_in_p.size + w_h_p.size + w_out_t_p.size) \
        + 4 * (b_in_p.size + b_h_p.size + b_out_p.size)
    tile_bytes = 2 * (tb * input_dim * 2) + 2 * (tb * 4) + 3 * tb * wpad * 4

    if stream_layers is None:
        stream_layers = resident_w_bytes + tile_bytes > int(0.55 * vmem_cap)

    if stream_layers:
        need = (2 * 2 * (wpad * wpad + wpad)          # double-buffered layer wts
                + 2 * (w_in_p.size + w_out_t_p.size)  # resident in/out proj
                + tb * wpad * 4                        # h scratch
                + tile_bytes + (4 << 20))
    else:
        need = resident_w_bytes + tile_bytes + (4 << 20)
    vmem_limit = int(min(max(need, 32 << 20), int(0.75 * vmem_cap)))

    out_shape = jax.ShapeDtypeStruct((n_tiles, 1, tb), jnp.float32)
    out_spec_resident = pl.BlockSpec((1, 1, tb), lambda i: (i, 0, 0))
    out_spec_streamed = pl.BlockSpec((1, 1, tb), lambda i, d: (i, 0, 0))

    if not stream_layers:
        out = pl.pallas_call(
            functools.partial(deep_relu_kernel_resident, relu_bf16=relu_bf16),
            out_shape=out_shape,
            grid_spec=pltpu.PrefetchScalarGridSpec(
                num_scalar_prefetch=0,
                grid=(n_tiles,),
                in_specs=[
                    pl.BlockSpec((tb, input_dim), lambda i: (i, 0)),        # x tile
                    pl.BlockSpec((input_dim, wpad), lambda i: (0, 0)),      # w_in
                    pl.BlockSpec((1, wpad), lambda i: (0, 0)),              # b_in
                    pl.BlockSpec((depth, wpad, wpad), lambda i: (0, 0, 0)),  # w_h
                    pl.BlockSpec((depth, 1, wpad), lambda i: (0, 0, 0)),     # b_h
                    pl.BlockSpec((1, wpad), lambda i: (0, 0)),              # w_out^T
                    pl.BlockSpec((1, 1), lambda i: (0, 0)),                 # b_out
                ],
                out_specs=out_spec_resident,
            ),
            compiler_params=pltpu.CompilerParams(
                dimension_semantics=("parallel",),
                vmem_limit_bytes=vmem_limit,
            ),
            interpret=interpret,
        )(xp, w_in_p, b_in_p, w_h_p, b_h_p, w_out_t_p, b_out_p)
    else:
        out = pl.pallas_call(
            deep_relu_kernel_streamed,
            out_shape=out_shape,
            grid_spec=pltpu.PrefetchScalarGridSpec(
                num_scalar_prefetch=0,
                grid=(n_tiles, depth),
                in_specs=[
                    pl.BlockSpec((tb, input_dim), lambda i, d: (i, 0)),
                    pl.BlockSpec((input_dim, wpad), lambda i, d: (0, 0)),
                    pl.BlockSpec((1, wpad), lambda i, d: (0, 0)),
                    pl.BlockSpec((1, wpad, wpad), lambda i, d: (d, 0, 0)),   # 1 layer
                    pl.BlockSpec((1, 1, wpad), lambda i, d: (d, 0, 0)),
                    pl.BlockSpec((1, wpad), lambda i, d: (0, 0)),
                    pl.BlockSpec((1, 1), lambda i, d: (0, 0)),
                ],
                out_specs=out_spec_streamed,
                scratch_shapes=[pltpu.VMEM((tb, wpad), jnp.float32)],        # h carry
            ),
            compiler_params=pltpu.CompilerParams(
                dimension_semantics=("parallel", "arbitrary"),
                vmem_limit_bytes=vmem_limit,
            ),
            interpret=interpret,
        )(xp, w_in_p, b_in_p, w_h_p, b_h_p, w_out_t_p, b_out_p)

    # (n_tiles, 1, tb) -> (batch, 1); only real output bytes ever hit HBM.
    return out.reshape(pb, 1)[:batch]


# --------------------------------------------------------------------------
# Reference / init
# --------------------------------------------------------------------------

def init_params(key, input_dim, L, M):
    """Deterministic parameter init matching DeepReluNet.__init__ shapes."""
    depth = L + 1
    width = M + input_dim + 1
    keys = jax.random.split(key, 4 + 2 * depth)

    def linear(kw, kb, fan_in, fan_out):
        bound = 1.0 / jnp.sqrt(fan_in)
        w = jax.random.uniform(kw, (fan_in, fan_out), jnp.float32, -bound, bound)
        b = jax.random.uniform(kb, (1, fan_out), jnp.float32, -bound, bound)
        return w, b

    w_in, b_in = linear(keys[0], keys[1], input_dim, width)
    w_h_list, b_h_list = [], []
    for d in range(depth):
        w, b = linear(keys[2 + 2 * d], keys[3 + 2 * d], width, width)
        w_h_list.append(w)
        b_h_list.append(b)
    w_h = jnp.stack(w_h_list)                 # (depth, width, width)
    b_h = jnp.stack(b_h_list)                 # (depth, 1, width)
    w_out, b_out = linear(keys[-2], keys[-1], width, 1)
    return w_in, b_in, w_h, b_h, w_out, b_out


def reference_forward(x, w_in, b_in, w_h, b_h, w_out, b_out, cast=jnp.float32):
    """Pure-JAX reference; cast=bf16 mirrors the kernel's MXU numerics."""
    c = lambda a: a.astype(cast)
    h = jnp.dot(c(x), c(w_in), preferred_element_type=jnp.float32) + b_in
    for i in range(w_h.shape[0]):
        h = jnp.maximum(
            jnp.dot(c(h), c(w_h[i]), preferred_element_type=jnp.float32) + b_h[i],
            0.0)
    return jnp.dot(c(h), c(w_out), preferred_element_type=jnp.float32) + b_out


if __name__ == "__main__":
    input_dim, L, M = 8, 2, 23          # width = M + input_dim + 1 = 32, depth = 3
    batch = 50                          # deliberately not a multiple of the tile

    key = jax.random.PRNGKey(0)
    k_x, k_p = jax.random.split(key)
    x = jax.random.normal(k_x, (batch, input_dim), jnp.float32)
    raw_params = init_params(k_p, input_dim, L, M)
    params = prepare_params(*raw_params)        # pad/cast once, not per call

    # Resident-weight path, small tile to exercise the batch grid + padding.
    out = deep_relu_net(x, params, block_batch=16)
    out = jax.block_until_ready(out)

    # Layer-streamed path (used automatically for large configs) — validate it.
    out_stream = deep_relu_net(x, params, block_batch=16, stream_layers=True)
    out_stream = jax.block_until_ready(out_stream)

    ref_bf16 = reference_forward(x, *raw_params, cast=jnp.bfloat16)
    ref_f32 = reference_forward(x, *raw_params, cast=jnp.float32)

    assert out.shape == (batch, 1)
    assert out_stream.shape == (batch, 1)
    # Tight check against a reference with matching bf16-operand / f32-accum numerics.
    assert jnp.allclose(out, ref_bf16, atol=2e-3, rtol=2e-3)
    assert jnp.allclose(out_stream, ref_bf16, atol=2e-3, rtol=2e-3)
    # Loose check against the pure-f32 PyTorch-equivalent forward.
    assert jnp.allclose(out, ref_f32, atol=1e-1, rtol=5e-2)

    print("KERNEL_OK")
</pallas_src>

<mosaic_0001>
module attributes {stable_mosaic.version = 11 : i64} {
  func.func @deep_relu_kernel_resident(%arg0: i32, %arg1: memref<16x8xbf16, #tpu.memory_space<vmem>>, %arg2: memref<8x128xbf16, #tpu.memory_space<vmem>>, %arg3: memref<1x128xf32, #tpu.memory_space<vmem>>, %arg4: memref<3x128x128xbf16, #tpu.memory_space<vmem>>, %arg5: memref<3x1x128xf32, #tpu.memory_space<vmem>>, %arg6: memref<1x128xbf16, #tpu.memory_space<vmem>>, %arg7: memref<1x1xf32, #tpu.memory_space<vmem>>, %arg8: memref<1x1x16xf32, #tpu.memory_space<vmem>>) attributes {dimension_semantics = [#tpu.dimension_semantics<parallel>], iteration_bounds = array<i64: 4>, scalar_prefetch = 0 : i64, scratch_operands = 0 : i64, tpu.core_type = #tpu.core_type<tc>, window_params = [{transform_indices = @transform_0, window_bounds = array<i64: 16, 8>}, {pipeline_mode = #tpu.pipeline_mode<synchronous>, transform_indices = @transform_1, window_bounds = array<i64: 8, 128>}, {pipeline_mode = #tpu.pipeline_mode<synchronous>, transform_indices = @transform_2, window_bounds = array<i64: 1, 128>}, {pipeline_mode = #tpu.pipeline_mode<synchronous>, transform_indices = @transform_3, window_bounds = array<i64: 3, 128, 128>}, {pipeline_mode = #tpu.pipeline_mode<synchronous>, transform_indices = @transform_4, window_bounds = array<i64: 3, 1, 128>}, {pipeline_mode = #tpu.pipeline_mode<synchronous>, transform_indices = @transform_5, window_bounds = array<i64: 1, 128>}, {pipeline_mode = #tpu.pipeline_mode<synchronous>, transform_indices = @transform_6, window_bounds = array<i64: 1, 1>}, {transform_indices = @transform_7, window_bounds = array<i64: 1, 1, 16>}]} {
    %c0 = arith.constant 0 : index
    %c0_0 = arith.constant 0 : index
    %0 = vector.load %arg1[%c0, %c0_0] : memref<16x8xbf16, #tpu.memory_space<vmem>>, vector<16x8xbf16>
    %c0_1 = arith.constant 0 : index
    %c0_2 = arith.constant 0 : index
    %1 = vector.load %arg2[%c0_1, %c0_2] : memref<8x128xbf16, #tpu.memory_space<vmem>>, vector<8x128xbf16>
    %cst = arith.constant dense<0.000000e+00> : vector<16x128xf32>
    %2 = tpu.matmul %0, %1, %cst {dimension_numbers = #tpu.dot_dimension_numbers<[1], [0], [0], [1], [0, 0, 1, 1], [], []>} : vector<16x8xbf16>, vector<8x128xbf16>, vector<16x128xf32> -> vector<16x128xf32>
    %c0_3 = arith.constant 0 : index
    %c0_4 = arith.constant 0 : index
    %3 = vector.load %arg3[%c0_3, %c0_4] : memref<1x128xf32, #tpu.memory_space<vmem>>, vector<1x128xf32>
    %4 = vector.broadcast %3 : vector<1x128xf32> to vector<16x128xf32>
    %5 = arith.addf %2, %4 : vector<16x128xf32>
    %c0_i32 = arith.constant 0 : i32
    %6 = arith.truncf %5 : vector<16x128xf32> to vector<16x128xbf16>
    %7 = arith.index_cast %c0_i32 : i32 to index
    %c0_5 = arith.constant 0 : index
    %c0_6 = arith.constant 0 : index
    %8 = vector.load %arg4[%7, %c0_5, %c0_6] : memref<3x128x128xbf16, #tpu.memory_space<vmem>>, vector<1x128x128xbf16>
    %9 = vector.shape_cast %8 : vector<1x128x128xbf16> to vector<128x128xbf16>
    %cst_7 = arith.constant dense<0.000000e+00> : vector<16x128xf32>
    %10 = tpu.matmul %6, %9, %cst_7 {dimension_numbers = #tpu.dot_dimension_numbers<[1], [0], [0], [1], [0, 0, 1, 1], [], []>} : vector<16x128xbf16>, vector<128x128xbf16>, vector<16x128xf32> -> vector<16x128xf32>
    %11 = arith.index_cast %c0_i32 : i32 to index
    %c0_8 = arith.constant 0 : index
    %c0_9 = arith.constant 0 : index
    %12 = vector.load %arg5[%11, %c0_8, %c0_9] : memref<3x1x128xf32, #tpu.memory_space<vmem>>, vector<1x1x128xf32>
    %13 = vector.shape_cast %12 : vector<1x1x128xf32> to vector<1x128xf32>
    %14 = vector.broadcast %13 : vector<1x128xf32> to vector<16x128xf32>
    %15 = arith.addf %10, %14 : vector<16x128xf32>
    %cst_10 = arith.constant 0.000000e+00 : f32
    %16 = vector.broadcast %cst_10 : f32 to vector<16x128xf32>
    %17 = arith.maximumf %15, %16 : vector<16x128xf32>
    %c1_i32 = arith.constant 1 : i32
    %18 = arith.truncf %17 : vector<16x128xf32> to vector<16x128xbf16>
    %19 = arith.index_cast %c1_i32 : i32 to index
    %c0_11 = arith.constant 0 : index
    %c0_12 = arith.constant 0 : index
    %20 = vector.load %arg4[%19, %c0_11, %c0_12] : memref<3x128x128xbf16, #tpu.memory_space<vmem>>, vector<1x128x128xbf16>
    %21 = vector.shape_cast %20 : vector<1x128x128xbf16> to vector<128x128xbf16>
    %cst_13 = arith.constant dense<0.000000e+00> : vector<16x128xf32>
    %22 = tpu.matmul %18, %21, %cst_13 {dimension_numbers = #tpu.dot_dimension_numbers<[1], [0], [0], [1], [0, 0, 1, 1], [], []>} : vector<16x128xbf16>, vector<128x128xbf16>, vector<16x128xf32> -> vector<16x128xf32>
    %23 = arith.index_cast %c1_i32 : i32 to index
    %c0_14 = arith.constant 0 : index
    %c0_15 = arith.constant 0 : index
    %24 = vector.load %arg5[%23, %c0_14, %c0_15] : memref<3x1x128xf32, #tpu.memory_space<vmem>>, vector<1x1x128xf32>
    %25 = vector.shape_cast %24 : vector<1x1x128xf32> to vector<1x128xf32>
    %26 = vector.broadcast %25 : vector<1x128xf32> to vector<16x128xf32>
    %27 = arith.addf %22, %26 : vector<16x128xf32>
    %cst_16 = arith.constant 0.000000e+00 : f32
    %28 = vector.broadcast %cst_16 : f32 to vector<16x128xf32>
    %29 = arith.maximumf %27, %28 : vector<16x128xf32>
    %c2_i32 = arith.constant 2 : i32
    %30 = arith.truncf %29 : vector<16x128xf32> to vector<16x128xbf16>
    %31 = arith.index_cast %c2_i32 : i32 to index
    %c0_17 = arith.constant 0 : index
    %c0_18 = arith.constant 0 : index
    %32 = vector.load %arg4[%31, %c0_17, %c0_18] : memref<3x128x128xbf16, #tpu.memory_space<vmem>>, vector<1x128x128xbf16>
    %33 = vector.shape_cast %32 : vector<1x128x128xbf16> to vector<128x128xbf16>
    %cst_19 = arith.constant dense<0.000000e+00> : vector<16x128xf32>
    %34 = tpu.matmul %30, %33, %cst_19 {dimension_numbers = #tpu.dot_dimension_numbers<[1], [0], [0], [1], [0, 0, 1, 1], [], []>} : vector<16x128xbf16>, vector<128x128xbf16>, vector<16x128xf32> -> vector<16x128xf32>
    %35 = arith.index_cast %c2_i32 : i32 to index
    %c0_20 = arith.constant 0 : index
    %c0_21 = arith.constant 0 : index
    %36 = vector.load %arg5[%35, %c0_20, %c0_21] : memref<3x1x128xf32, #tpu.memory_space<vmem>>, vector<1x1x128xf32>
    %37 = vector.shape_cast %36 : vector<1x1x128xf32> to vector<1x128xf32>
    %38 = vector.broadcast %37 : vector<1x128xf32> to vector<16x128xf32>
    %39 = arith.addf %34, %38 : vector<16x128xf32>
    %cst_22 = arith.constant 0.000000e+00 : f32
    %40 = vector.broadcast %cst_22 : f32 to vector<16x128xf32>
    %41 = arith.maximumf %39, %40 : vector<16x128xf32>
    %c3_i32 = arith.constant 3 : i32
    %42 = arith.truncf %41 : vector<16x128xf32> to vector<16x128xbf16>
    %c0_23 = arith.constant 0 : index
    %c0_24 = arith.constant 0 : index
    %43 = vector.load %arg6[%c0_23, %c0_24] : memref<1x128xbf16, #tpu.memory_space<vmem>>, vector<1x128xbf16>
    %44 = tpu.transpose %42, [1, 0] : vector<16x128xbf16> -> vector<128x16xbf16>
    %cst_25 = arith.constant dense<0.000000e+00> : vector<1x16xf32>
    %45 = tpu.matmul %43, %44, %cst_25 {dimension_numbers = #tpu.dot_dimension_numbers<[1], [0], [0], [1], [0, 0, 1, 1], [], []>} : vector<1x128xbf16>, vector<128x16xbf16>, vector<1x16xf32> -> vector<1x16xf32>
    %c0_26 = arith.constant 0 : index
    %c0_27 = arith.constant 0 : index
    %46 = vector.load %arg7[%c0_26, %c0_27] : memref<1x1xf32, #tpu.memory_space<vmem>>, vector<1x1xf32>
    %47 = vector.broadcast %46 : vector<1x1xf32> to vector<1x16xf32>
    %48 = arith.addf %45, %47 : vector<1x16xf32>
    %49 = vector.shape_cast %48 : vector<1x16xf32> to vector<1x1x16xf32>
    %c0_28 = arith.constant 0 : index
    %c0_29 = arith.constant 0 : index
    %c0_30 = arith.constant 0 : index
    %50 = vector.load %arg8[%c0_28, %c0_29, %c0_30] : memref<1x1x16xf32, #tpu.memory_space<vmem>>, vector<1x1x16xf32>
    tpu.vector_store %arg8[%c0_28, %c0_29, %c0_30], %49 {strides = array<i32>} : memref<1x1x16xf32, #tpu.memory_space<vmem>>, vector<1x1x16xf32>,
    return
  }
  func.func @transform_0(%arg0: i32) -> (i32, i32) {
    %c0_i32 = arith.constant 0 : i32
    %c0_i32_0 = arith.constant 0 : i32
    return %arg0, %c0_i32 : i32, i32
  }
  func.func @transform_1(%arg0: i32) -> (i32, i32) {
    %c0_i32 = arith.constant 0 : i32
    %c0_i32_0 = arith.constant 0 : i32
    %c0_i32_1 = arith.constant 0 : i32
    return %c0_i32, %c0_i32_0 : i32, i32
  }
  func.func @transform_2(%arg0: i32) -> (i32, i32) {
    %c0_i32 = arith.constant 0 : i32
    %c0_i32_0 = arith.constant 0 : i32
    %c0_i32_1 = arith.constant 0 : i32
    return %c0_i32, %c0_i32_0 : i32, i32
  }
  func.func @transform_3(%arg0: i32) -> (i32, i32, i32) {
    %c0_i32 = arith.constant 0 : i32
    %c0_i32_0 = arith.constant 0 : i32
    %c0_i32_1 = arith.constant 0 : i32
    %c0_i32_2 = arith.constant 0 : i32
    return %c0_i32, %c0_i32_0, %c0_i32_1 : i32, i32, i32
  }
  func.func @transform_4(%arg0: i32) -> (i32, i32, i32) {
    %c0_i32 = arith.constant 0 : i32
    %c0_i32_0 = arith.constant 0 : i32
    %c0_i32_1 = arith.constant 0 : i32
    %c0_i32_2 = arith.constant 0 : i32
    return %c0_i32, %c0_i32_0, %c0_i32_1 : i32, i32, i32
  }
  func.func @transform_5(%arg0: i32) -> (i32, i32) {
    %c0_i32 = arith.constant 0 : i32
    %c0_i32_0 = arith.constant 0 : i32
    %c0_i32_1 = arith.constant 0 : i32
    return %c0_i32, %c0_i32_0 : i32, i32
  }
  func.func @transform_6(%arg0: i32) -> (i32, i32) {
    %c0_i32 = arith.constant 0 : i32
    %c0_i32_0 = arith.constant 0 : i32
    %c0_i32_1 = arith.constant 0 : i32
    return %c0_i32, %c0_i32_0 : i32, i32
  }
  func.func @transform_7(%arg0: i32) -> (i32, i32, i32) {
    %c0_i32 = arith.constant 0 : i32
    %c0_i32_0 = arith.constant 0 : i32
    %c0_i32_1 = arith.constant 0 : i32
    return %arg0, %c0_i32, %c0_i32_0 : i32, i32, i32
  }
}

</mosaic_0001>

<bundles_post_ra>
// kernel: tpu_custom_call.1
= control target key start
LH: loop header
LB: loop body
LE: loop exit
PB: predicated region body
PF: predicated region fallthrough
CT: control target
= control target key end

     0   :  { %s1404_s0 = inlined_call_operand.vmem [shape: bf16[64,8], index: 0, kind: input, shape index: {}]   ;;  %s1405_s1 = inlined_call_operand.vmem [shape: bf16[8,128], index: 1, kind: input, shape index: {}]   ;;  %s1406_s2 = inlined_call_operand.vmem [shape: f32[1,128], index: 2, kind: input, shape index: {}]   ;;  %s1407_s3 = inlined_call_operand.hbm [shape: bf16[3,128,128], index: 3, kind: input, shape index: {}]   ;;  %s1408_s4 = inlined_call_operand.vmem [shape: f32[3,1,128], index: 4, kind: input, shape index: {}]   ;;  %s1409_s5 = inlined_call_operand.vmem [shape: bf16[1,128], index: 5, kind: input, shape index: {}]   ;;  %s1410_s6 = inlined_call_operand.<no memory space> [shape: f32[1,1], index: 6, kind: input, shape index: {}]   ;;  %s1411_s7 = inlined_call_operand.hbm [shape: f32[4,1,16], index: 7, kind: output, shape index: {}]  }
   0x1   :  { %v12_v0 = vstv %s1410_s6 }
   0x2   :  { %13 = vst [vmem:[#allocation2] sm:$0x1] %v12_v0 }
   0x3   :  { %14 = vsyncpa [#allocation4], 0 }
   0x4   :  { %15 = vsyncpa [#allocation5], 0 }
   0x5   :  { %17 = vsyncpa [#allocation5 + $0x1], 0  ;;  %s1216_s26 = smov 0   ;;  %s1218_s27 = smov 0  }
   0x6   :  { %s1220_s28 = smov 0   ;;  %s1222_s29 = smov 0  }
   0x7 LB: > { %s1237_s6 = sadd.s32 4294967295, %s1164_s29   ;;  %s843_s30 = sadd.s32 4294967294, %s1164_s29   ;;  %s1164_s29 = sphi %s1222_s29, %s1427_s29   ;;  %s1160_s28 = sphi %s1220_s28, %s1426_s28   ;;  %s1156_s27 = sphi %s1218_s27, %s1425_s27   ;;  %s1152_s26 = sphi %s1216_s26, %s1424_s26  }
   0x8   : > { %s1241_s8 = sadd.s32 1, %s1164_s29   ;;  %s182_s9 = sadd.s32 1, %s1160_s28 }
   0x9   : > { %s179_s10 = ssub.s32 %s1164_s29, %s1241_s8  ;;  %p192_p0 = scmp.ne.s32.totalorder %s1160_s28, %s1156_s27 }
   0xa   : > { %p180_p1 = scmp.eq.s32.totalorder %s179_s10, 0  ;;  %p193_p2 = scmp.eq.s32.totalorder %s1237_s6, 3 }
   0xb   : > { %p198_p3 = scmp.ne.s32.totalorder %s1156_s27, %s1152_s26  ;;  %p199_p4 = scmp.eq.s32.totalorder %s843_s30, 3 }
   0xc   : > { %s1252_s11 = scalar_select %p180_p1, %s1160_s28, %s182_s9  }
   0xd   : > { %p1254_p5 = por %p193_p2, %p192_p0  ;;  %p1258_p6 = por %p199_p4, %p198_p3 }
   0xe   : > { %p844_p7 = scmp.ge.s32.totalorder %s1164_s29, 1  ;;  %p206_p8 = scmp.lt.s32.totalorder %s1164_s29, 5 }
   0xf   : > { %s1415_s12 = scalar_select %p1254_p5, 1, 0 }
  0x10   : > { %s1416_s13 = scalar_select %p1258_p6, 1, 0 }
  0x11   : > { %p1412_p9 = scmp.eq.s32.totalorder %s1237_s6, 0  ;;  %p1265_p10 = pnand %p844_p7, %p206_p8 }
  0x12   : > { %s1166_s15 = smov [#allocation3]   ;;  %s1070_s20 = scalar_lea.hbm %s1407_s3, 3072 }
  0x13   : > { %s1417_s14 = scalar_select %p1265_p10, 1, 0 }
  0x14   : > { %s224_s16 = sshll.u32 %s1166_s15, 4  ;;  %p995_p11 = pneg %p1265_p10  ;;  %s225_s16 = int_to_ptr.vmem [resolvable:$true] %s224_s16 }
  0x15   : > { %p1071_p13 = scmp.ne.s32.totalorder %s1407_s3, %s1070_s20  ;;  %p1077_p3 = scmp.lt.u32.totalorder %s1070_s20, %s1407_s3 }
  0x16   : > { %p1273_p12 = pnand %p1412_p9, %p995_p11 }
  0x18   : > { %p1072_p0 = pneg %p1273_p12 }
  0x1a   : > { %p1073_p1 = pnand %p1072_p0, %p1071_p13 }
  0x1c   : > { %p1074_p2 = pneg %p1073_p1 }
  0x1e   : > { %p1079_p4 = pnand %p1077_p3, %p1074_p2 }
  0x20   : > { %1082 = shalt.err (!%p1079_p4)
}
  0x21   : > { %s1083_s25 = scalar_lea.vmem %s225_s16, 3072  ;;  %p1091_p9 = scmp.lt.s32.totalorder %s225_s16, %s225_s16 }
  0x22   : > { %p1084_p7 = scmp.ne.s32.totalorder %s225_s16, %s1083_s25  ;;  %p1092_p6 = scmp.lt.s32.totalorder %s1083_s25, %s1083_s25 }
  0x24   : > { %p1086_p8 = pnand %p1084_p7, %p1072_p0  ;;  %p1093_p5 = por %p1092_p6, %p1091_p9 }
  0x26   : > { %p1087_p11 = pneg %p1086_p8 }
  0x28   : > { %p1094_p10 = pnand %p1093_p5, %p1087_p11 }
  0x2a   : > { %1097 = shalt.err (!%p1094_p10)
}
  0x2b   : > { %s1167_s30 = smov 64   ;;  %s1168_s9 = smov 4  }
  0x2c   : > { %998 = dma.hbm_to_vmem [thread:$0]  (!%p1273_p12), %s1407_s3, 3072, %s225_s16, [#allocation4], %s1167_s30, %s1167_s30, %s1168_s9  }
  0x2d   : > { %p1419_p13 = scmp.ne.s32.totalorder %s1417_s14, 0 }
  0x2e   : > { %p1420_p1 = scmp.eq.s32.totalorder (!%p1419_p13), %s1237_s6, 0 }
  0x2f   : > { %258 = sbr.rel (%p1419_p13) target bundleno = 1175 (0x497), region = 48 }
  0x36   : > { %1143 = dma.done.wait (%p1420_p1), [#allocation4], 3072   ;;  %p1421_p0 = pmov %p1420_p1 }
  0x37   : > { %s849_s18 = sshll.u32 %s1237_s6, 1  ;;  %v1169_v1 = vmov 0.0   ;;  %vm1170_vm0 = vmmov 0   ;;  %vm315_vm1 = vcmask 1043456   ;;  %v298_v2 = vld [vmem:[%s1405_s1] sm:$0xf] }
  0x38   : > { %1145 = vsyncadd (%p1421_p0), [#allocation4], 4294964224  ;;  %917 = vmatprep.subr.bf16.mxu0 %v1169_v1  ;;  %919 = vmatprep.mubr.msk.bf16.mxu0 %vm1170_vm0, %v1169_v1  ;;  %p290_p5 = scmp.lt.s32.totalorder %s849_s18, 7  ;;  %v317_v3 = vsel %vm315_vm1, %v298_v2, 0  ;;  %vm311_vm2 = vcmask 64512   ;;  %v1046_v5 = vld [vmem:[#allocation3] sm:$0xff]  }
  0x39   : > { %923 = vmatprep.subr.bf16.mxu1 %v1169_v1  ;;  %939 = vmatprep.mubr.msk.bf16.mxu1 %vm1170_vm0, %v1169_v1  ;;  %v1047_v6 = vld [vmem:[#allocation3 + $0x8] sm:$0xff]   ;;  %v1048_v7 = vld [vmem:[#allocation3 + $0x10] sm:$0xff]   ;;  %v1049_v8 = vld [vmem:[#allocation3 + $0x18] sm:$0xff]   ;;  %v1171_v58 = vmov 0   ;;  %s287_s16 = sand.u32 1, %s1156_s27   ;;  %s883_s17 = sshll.u32 %s1237_s6, 4 }
  0x3a   : > { %s1429_s18 = smov (!%p290_p5, %s849_s18), 7  ;;  %918 = vmatpush3.bf16.msra.mxu0 %v317_v3  ;;  %924 = vmatpush3.bf16.msra.mxu1 %v1046_v5  ;;  %v1050_v9 = vld [vmem:[#allocation3 + $0x20] sm:$0xff]   ;;  %v1051_v10 = vld [vmem:[#allocation3 + $0x28] sm:$0xff]   ;;  %v1052_v11 = vld [vmem:[#allocation3 + $0x30] sm:$0xff]   ;;  %vm761_vm3 = vcmask 122880   ;;  %s1362_s23 = scalar_lea.hbm %s1411_s7, %s883_s17 }
  0x3b   : > { %s850_s14 = sshll.u32 %s1429_s18, 2  ;;  %943 = vmatprep.subr.bf16.mxu0 %v1169_v1  ;;  %925 = vmatprep.subr.bf16.mxu1 %v1169_v1  ;;  %v1053_v12 = vld [vmem:[#allocation3 + $0x38] sm:$0xff]   ;;  %v1054_v13 = vld [vmem:[#allocation3 + $0x40] sm:$0xff]   ;;  %v1055_v14 = vld [vmem:[#allocation3 + $0x48] sm:$0xff]   ;;  %s764_s6 = scalar_lea.sflag [#allocation5], %s287_s16 }
  0x3c   : > { %s293_s19 = scalar_lea.vmem %s1404_s0, %s850_s14  ;;  %v1056_v15 = vld [vmem:[#allocation3 + $0x50] sm:$0xff]   ;;  %v1057_v16 = vld [vmem:[#allocation3 + $0x58] sm:$0xff]   ;;  %v1058_v17 = vld [vmem:[#allocation3 + $0x60] sm:$0xff]   ;;  %1044 = vset.pattern.permute.xlu0 %v1171_v58  ;;  %p1422_p9 = scmp.ne.s32.totalorder %s1415_s12, 0 }
  0x3d   : > { %v1045_v4 = vld [vmem:[%s293_s19] sm:$0xff]   ;;  %v1059_v18 = vld [vmem:[#allocation3 + $0x68] sm:$0xff]   ;;  %v1060_v27 = vld [vmem:[#allocation3 + $0x70] sm:$0xff]   ;;  %s288_s19 = scalar_lea.vmem [#allocation6], %s287_s16  ;;  %s1172_s25 = smov [#allocation6]  }
  0x3e   : > { %920 = vmatmul.mubr.msk.bf16.vlgmr.msra.gmra.mrb[0].mxu0 %vm311_vm2, %v1045_v4  ;;  %926 = vmatpush3.bf16.msra.mxu1 %v1047_v6  ;;  %v851_v19 = vld [vmem:[%s1406_s2] ss:$0 sm:$0xff]  ;;  %v1062_v29 = vld [vmem:[#allocation3 + $0x80] sm:$0xff]   ;;  %v1063_v30 = vld [vmem:[#allocation3 + $0x88] sm:$0xff]   ;;  %v717_v6 = vlaneseq  ;;  %s776_s20 = sshll.u32 %s288_s19, 4  ;;  %s1102_s30 = sshll.u32 %s1172_s25, 4  ;;  %s1364_s20 = int_to_ptr.vmem [resolvable:$true] %s776_s20  ;;  %s1103_s30 = int_to_ptr.vmem [resolvable:$false] %s1102_s30 }
  0x3f   : > { %959 = vmatprep.mubr.msk.bf16.mxu0 %vm1170_vm0, %v1169_v1  ;;  %927 = vmatprep.subr.bf16.mxu1 %v1169_v1  ;;  %v1061_v28 = vld [vmem:[#allocation3 + $0x78] sm:$0xff]   ;;  %v1064_v31 = vld [vmem:[#allocation3 + $0x90] sm:$0xff]   ;;  %v1066_v33 = vld [vmem:[#allocation3 + $0xa0] sm:$0xff]   ;;  %s1098_s24 = scalar_lea.vmem %s1364_s20, 16  ;;  %s1104_s9 = scalar_lea.vmem %s1103_s30, 32 }
  0x40   : > { %944 = vmatpush3.bf16.msra.mxu0 %v1054_v13  ;;  %v1065_v32 = vld [vmem:[#allocation3 + $0x98] sm:$0xff]   ;;  %v1067_v34 = vld [vmem:[#allocation3 + $0xa8] sm:$0xff]   ;;  %v1068_v45 = vld [vmem:[#allocation3 + $0xb0] sm:$0xff]   ;;  %p1099_p6 = scmp.ne.s32.totalorder %s1364_s20, %s1098_s24  ;;  %p1105_p2 = scmp.lt.s32.totalorder %s1364_s20, %s1103_s30 }
  0x41   : > { %945 = vmatprep.subr.bf16.mxu0 %v1169_v1  ;;  %v854_v35 = vld [vmem:[%s1408_s4] ss:$0 sm:$0xff]  ;;  %v864_v47 = vld [vmem:[%s1408_s4 + $0x1] ss:$0 sm:$0xff]  ;;  %v874_v59 = vld [vmem:[%s1408_s4 + $0x2] ss:$0 sm:$0xff]  ;;  %p1106_p3 = scmp.lt.s32.totalorder %s1104_s9, %s1098_s24 }
  0x42   : > { %928 = vmatpush3.bf16.msra.mxu1 %v1048_v7  ;;  %v1069_v46 = vld [vmem:[#allocation3 + $0xb8] sm:$0xff]   ;;  %v718_v7 = vshrl.u32 %v717_v6, 7  ;;  %p1100_p10 = pnand %p1099_p6, %p1422_p9 }
  0x43   : > { %929 = vmatprep.subr.bf16.mxu1 %v1169_v1  ;;  %v711_v57 = vld [vmem:[#allocation2] sm:$0x1]  ;;  %p1107_p4 = por %p1106_p3, %p1105_p2 }
  0x44   : > { %946 = vmatpush3.bf16.msra.mxu0 %v1055_v14  ;;  %714 = vperm.xlu0 %1044, %v711_v57   ;;  %v710_v5 = vld [vmem:[%s1409_s5] sm:$0x1]  ;;  %p1101_p12 = pneg %p1100_p10 }
  0x45   : > { %947 = vmatprep.subr.bf16.mxu0 %v1169_v1 }
  0x46   : > { %930 = vmatpush3.bf16.msra.mxu1 %v1049_v8  ;;  %v719_v8 = vsub.s32 0, %v718_v7  ;;  %p1108_p7 = pnand %p1107_p4, %p1101_p12 }
  0x47   : > { %931 = vmatprep.subr.bf16.mxu1 %v1169_v1 }
  0x48   : > { %948 = vmatpush3.bf16.msra.mxu0 %v1056_v15 }
  0x49   : > { %949 = vmatprep.subr.bf16.mxu0 %v1169_v1 }
  0x4a   : > { %932 = vmatpush3.bf16.msra.mxu1 %v1050_v9 }
  0x4b   : > { %933 = vmatprep.subr.bf16.mxu1 %v1169_v1 }
  0x4c   : > { %950 = vmatpush3.bf16.msra.mxu0 %v1057_v16 }
  0x4d   : > { %951 = vmatprep.subr.bf16.mxu0 %v1169_v1 }
  0x4e   : > { %934 = vmatpush3.bf16.msra.mxu1 %v1051_v10 }
  0x4f   : > { %935 = vmatprep.subr.bf16.mxu1 %v1169_v1 }
  0x50   : > { %952 = vmatpush3.bf16.msra.mxu0 %v1058_v17 }
  0x51   : > { %953 = vmatprep.subr.bf16.mxu0 %v1169_v1 }
  0x52   : > { %936 = vmatpush3.bf16.msra.mxu1 %v1052_v11 }
  0x53   : > { %937 = vmatprep.subr.bf16.mxu1 %v1169_v1 }
  0x54   : > { %954 = vmatpush3.bf16.msra.mxu0 %v1059_v18 }
  0x55   : > { %955 = vmatprep.subr.bf16.mxu0 %v1169_v1 }
  0x56   : > { %938 = vmatpush3.bf16.msra.mxu1 %v1053_v12 }
  0x57   : > { %963 = vmatprep.subr.bf16.mxu1 %v1169_v1 }
  0x58   : > { %956 = vmatpush3.bf16.msra.mxu0 %v1060_v27 }
  0x59   : > { %957 = vmatprep.subr.bf16.mxu0 %v1169_v1 }
  0x5c   : > { %958 = vmatpush3.bf16.msra.mxu0 %v1061_v28 }
  0x5d   : > { %983 = vmatprep.subr.bf16.mxu0 %v1169_v1 }
  0xc3   : > { %v715_v9 = vpop.permute.xlu0 %714 }
  0xc4   : > { %v720_v10 = vrot.slane %v715_v9, %v719_v8 }
 0x111   : > { %v353_v20 = vpop.f32.mrb[0].mxu0 }
 0x112   : > { %v921_v21 = vpop.f32.mrb[1].mxu0  ;;  %v354_v23 = vadd.f32 %v851_v19, %v353_v20 }
 0x113   : > { %v356_v22 = vpop.f32.mrb[2].mxu0 }
 0x114   : > { %v357_v24 = vadd.f32 %v851_v19, %v356_v22  ;;  %v922_v25 = vpop.f32.mrb[3].mxu0 }
 0x116   : > { %v360_v26 = vpack.c.bf16 %v357_v24, %v354_v23 }
 0x118   : > { %940 = vmatmul.mubr.bf16.vlgmr.msra.gmra.mrb[0].mxu1 %v360_v26 }
 0x119   : > { %979 = vmatprep.mubr.msk.bf16.mxu1 %vm1170_vm0, %v1169_v1  ;;  %964 = vmatpush3.bf16.msra.mxu1 %v1062_v29 }
 0x11a   : > { %965 = vmatprep.subr.bf16.mxu1 %v1169_v1 }
 0x11d   : > { %966 = vmatpush3.bf16.msra.mxu1 %v1063_v30 }
 0x11e   : > { %967 = vmatprep.subr.bf16.mxu1 %v1169_v1 }
 0x121   : > { %968 = vmatpush3.bf16.msra.mxu1 %v1064_v31 }
 0x122   : > { %969 = vmatprep.subr.bf16.mxu1 %v1169_v1 }
 0x125   : > { %970 = vmatpush3.bf16.msra.mxu1 %v1065_v32 }
 0x126   : > { %971 = vmatprep.subr.bf16.mxu1 %v1169_v1 }
 0x129   : > { %972 = vmatpush3.bf16.msra.mxu1 %v1066_v33 }
 0x12a   : > { %973 = vmatprep.subr.bf16.mxu1 %v1169_v1 }
 0x12d   : > { %974 = vmatpush3.bf16.msra.mxu1 %v1067_v34 }
 0x12e   : > { %975 = vmatprep.subr.bf16.mxu1 %v1169_v1 }
 0x131   : > { %976 = vmatpush3.bf16.msra.mxu1 %v1068_v45 }
 0x132   : > { %977 = vmatprep.subr.bf16.mxu1 %v1169_v1 }
 0x135   : > { %978 = vmatpush3.bf16.msra.mxu1 %v1069_v46 }
 0x1eb   : > { %v466_v36 = vpop.f32.mrb[0].mxu1 }
 0x1ec   : > { %v467_v37 = vadd.f32 %v854_v35, %v466_v36  ;;  %v941_v38 = vpop.f32.mrb[1].mxu1 }
 0x1ed   : > { %v469_v39 = vpop.f32.mrb[2].mxu1 }
 0x1ee   : > { %v470_v40 = vadd.f32 %v854_v35, %v469_v39  ;;  %v942_v41 = vpop.f32.mrb[3].mxu1  ;;  %v473_v42 = vmax.f32 %v467_v37, 0.0 }
 0x1f0   : > { %v474_v43 = vmax.f32 %v470_v40, 0.0 }
 0x1f2   : > { %v475_v44 = vpack.c.bf16 %v474_v43, %v473_v42 }
 0x1f4   : > { %960 = vmatmul.mubr.bf16.vlgmr.msra.gmra.mrb[4].mxu0 %v475_v44 }
 0x1f5   : > { %985 = vmatprep.mubr.msk.bf16.mxu0 %vm1170_vm0, %v1169_v1 }
 0x2c7   : > { %v583_v48 = vpop.f32.mrb[4].mxu0 }
 0x2c8   : > { %v584_v49 = vadd.f32 %v864_v47, %v583_v48  ;;  %v961_v50 = vpop.f32.mrb[5].mxu0 }
 0x2c9   : > { %v586_v51 = vpop.f32.mrb[6].mxu0 }
 0x2ca   : > { %v587_v52 = vadd.f32 %v864_v47, %v586_v51  ;;  %v962_v53 = vpop.f32.mrb[7].mxu0  ;;  %v590_v54 = vmax.f32 %v584_v49, 0.0 }
 0x2cc   : > { %v591_v55 = vmax.f32 %v587_v52, 0.0 }
 0x2ce   : > { %v592_v56 = vpack.c.bf16 %v591_v55, %v590_v54 }
 0x2d0   : > { %980 = vmatmul.mubr.bf16.vlgmr.msra.gmra.mrb[4].mxu1 %v592_v56 }
 0x3a3   : > { %v700_v60 = vpop.f32.mrb[4].mxu1 }
 0x3a4   : > { %v701_v61 = vadd.f32 %v874_v59, %v700_v60  ;;  %v981_v62 = vpop.f32.mrb[5].mxu1 }
 0x3a5   : > { %v703_v63 = vpop.f32.mrb[6].mxu1 }
 0x3a6   : > { %v704_v0 = vadd.f32 %v874_v59, %v703_v63  ;;  %v982_v1 = vpop.f32.mrb[7].mxu1  ;;  %v707_v2 = vmax.f32 %v701_v61, 0.0 }
 0x3a8   : > { %v708_v3 = vmax.f32 %v704_v0, 0.0 }
 0x3aa   : > { %v709_v4 = vpack.c.bf16 %v708_v3, %v707_v2 }
 0x3ac   : > { %984 = vmatpush3.bf16.xpose.msra.mxu0 %v709_v4 }
 0x3b3   : > { %986 = vmatmul.mubr.bf16.vlgmr.msra.gmra.mrb[8].mxu0 %v710_v5 }
 0x486   : > { %v755_v11 = vpop.f32.mrb[8].mxu0 }
 0x487   : > { %v756_v12 = vadd.f32 %v755_v11, %v720_v10  ;;  %v987_v13 = vpop.f32.mrb[9].mxu0 }
 0x488   : > { %v758_v14 = vpop.f32.mrb[10].mxu0 }
 0x489   : > { %v988_v15 = vpop.f32.mrb[11].mxu0  ;;  %762 = vst.msk [vmem:[%s288_s19] sm:$0x1] %vm761_vm3, %v756_v12 }
 0x48a   : > { %1111 = shalt.err (!%p1108_p7)
}
 0x48b   : > { %s1112_s10 = scalar_lea.hbm %s1362_s23, 16  ;;  %s1116_s14 = scalar_lea.hbm %s1411_s7, 64 }
 0x48c   : > { %p1113_p8 = scmp.ne.s32.totalorder %s1362_s23, %s1112_s10  ;;  %p1117_p1 = scmp.lt.u32.totalorder %s1362_s23, %s1411_s7 }
 0x48d   : > { %p1118_p0 = scmp.lt.u32.totalorder %s1116_s14, %s1112_s10  ;;  %p1120_p6 = scmp.lt.u32.totalorder %s1112_s10, %s1362_s23 }
 0x48e   : > { %p1114_p11 = pnand %p1113_p8, %p1422_p9 }
 0x48f   : > { %p1119_p5 = por %p1118_p0, %p1117_p1 }
 0x490   : > { %p1115_p13 = pneg %p1114_p11 }
 0x491   : > { %p1121_p10 = por %p1120_p6, %p1119_p5 }
 0x493   : > { %p1122_p12 = pnand %p1121_p10, %p1115_p13 }
 0x495   : > { %1125 = shalt.err (!%p1122_p12)
}
 0x496   : > { %993 = dma.vmem_to_hbm [thread:$0]  (%p1422_p9), %s1364_s20, 16, %s1362_s23, %s764_s6  }
 0x497 PF: > { %p1005_p2 = scmp.ge.s32.totalorder %s1164_s29, 2  ;;  %s788_s19 = sand.u32 1, %s1152_s26  }
 0x498   : > { %p1423_p3 = scmp.ne.s32.totalorder %s1416_s13, 0  ;;  %s789_s21 = scalar_lea.sflag [#allocation5], %s788_s19 }
 0x49a   : > { %p1000_p4 = pnand %p1005_p2, %p1423_p3 }
 0x49c   : > { %1147 = dma.done.wait (!%p1000_p4), %s789_s21, 16  }
 0x49d   : > { %1149 = vsyncadd (!%p1000_p4), %s789_s21, 4294967280  ;;  %p20_p7 = scmp.ge.s32.totalorder %s1241_s8, 6   ;;  %s1424_s26 = smov %s1156_s27 }
 0x49e   : > { %s1425_s27 = smov %s1160_s28  ;;  %s1426_s28 = smov %s1252_s11 }
 0x49f   : > { %s1427_s29 = smov %s1241_s8  ;;  %22 = sbr.rel (!%p20_p7) target bundleno = 7 (0x7), region = 92 }
 0x4a6   :  { %793 = vsyncpa [#allocation4], 1 }
 0x4a7   :  { %795 = vsyncpa [#allocation4 + $0x1], 1 }
 0x4a8   :  { %796 = vsyncpa [#allocation5], 1 }
 0x4a9   :  { %798 = vsyncpa [#allocation5 + $0x1], 1 }

</bundles_post_ra>
